<compile_context>
chip_gen: v6e
topology: v6e:2x2x1
jax: 0.10.0
libtpu: 0.0.40
codegen_flags: <defaults>
</compile_context>

<pallas_src>
import functools
import math

import jax
import jax.numpy as jnp
from jax.experimental import pallas as pl
from jax.experimental.pallas import tpu as pltpu


def _round_up(x, m):
    return (x + m - 1) // m * m


def _elu_plus_one(x):
    # F.elu(x) + 1  ==  x + 1  (x > 0)   |   exp(x)  (x <= 0)
    return jnp.where(x > 0, x + 1.0, jnp.exp(jnp.minimum(x, 0.0)))


def _choose_q_tile(S, target=256):
    """Largest divisor of S that is <= target (Q-tile for the attention grid)."""
    if S <= target:
        return S
    best = 1
    for t in range(1, target + 1):
        if S % t == 0:
            best = t
    return best if best >= 8 else S


# --------------------------------------------------------------------------
# Kernels
# --------------------------------------------------------------------------
def _prefix_qkv_kernel(x_ref, gate_ref, wqkv_ref, bqkv_ref, w1_ref, b1_ref,
                       w2_ref, b2_ref, ln_g_ref, ln_b_ref, weff_ref,
                       qkv_ref, bias_ref):
    """Per (bm, H) row-tile of hidden_states:
         qkv  = x @ Wqkv + bqkv                       (fused Q/K/V projection)
         ln   = LayerNorm(GELU(x@W1 + b1) @ W2 + b2)  (layer mapping)
         a    = gate*ln + (1-gate)*(elu(x)+1)         (adaptive features)
         bias = a @ W_eff                             (folded hierarchical prefix)
    """
    x = x_ref[...]                                    # (bm, H), compute dtype
    xf = x.astype(jnp.float32)

    # fused QKV projection (single MXU matmul, f32 accumulation)
    qkv = jnp.dot(x, wqkv_ref[...], preferred_element_type=jnp.float32)
    qkv_ref[...] = (qkv + bqkv_ref[...]).astype(qkv_ref.dtype)

    # adaptive feature mapping (layer-specific 2-layer MLP + LayerNorm)
    h = jnp.dot(x, w1_ref[...], preferred_element_type=jnp.float32) + b1_ref[...]
    # TODO(synk): torch nn.GELU defaults to the exact erf form; tanh approx here.
    h = jax.nn.gelu(h, approximate=True)
    m = jnp.dot(h.astype(x.dtype), w2_ref[...],
                preferred_element_type=jnp.float32) + b2_ref[...]
    mu = jnp.mean(m, axis=-1, keepdims=True)
    var = jnp.mean(jnp.square(m - mu), axis=-1, keepdims=True)
    ln = (m - mu) * jax.lax.rsqrt(var + 1e-5) * ln_g_ref[...] + ln_b_ref[...]

    gate = gate_ref[...]                              # (bm, 1) f32 per-batch scalar
    adaptive = gate * ln + (1.0 - gate) * _elu_plus_one(xf)

    # hierarchical prefix: mixing softmax + 3 matmuls pre-folded into one (H,H)
    bias_ref[...] = jnp.dot(adaptive.astype(x.dtype), weff_ref[...],
                            preferred_element_type=jnp.float32).astype(bias_ref.dtype)


def _attention_kernel(q_ref, k_ref, v_ref, o_ref, *, scale):
    """One (batch, q-tile): softmax((q*scale) @ k^T) @ v for all heads.

    q_ref: (tq, nh, hd)   k_ref / v_ref: (S, nh, hd)   o_ref: (tq, nh, hd)
    All heads of a batch are handled per step so the output write is lane-dense
    (tq, nh*hd) and the per-step pipeline overhead is amortised over nh heads.
    """
    nh = q_ref.shape[1]
    # TODO(synk): static head loop + full-S K/V per step; swap in a flash-style
    # KV-blocked online-softmax loop for very long sequences.
    for h in range(nh):
        q = (q_ref[:, h, :].astype(jnp.float32) * scale).astype(q_ref.dtype)
        k = k_ref[:, h, :]
        v = v_ref[:, h, :]
        s = jax.lax.dot_general(q, k, (((1,), (1,)), ((), ())),
                                preferred_element_type=jnp.float32)   # (tq, S)
        s = s - jnp.max(s, axis=-1, keepdims=True)
        p = jnp.exp(s)
        inv = pl.reciprocal(jnp.sum(p, axis=-1, keepdims=True), approx=True)
        o = jnp.dot(p.astype(v.dtype), v,
                    preferred_element_type=jnp.float32) * inv
        o_ref[:, h, :] = o.astype(o_ref.dtype)


def _out_proj_kernel(attn_ref, bias_ref, wo_ref, bo_ref, o_ref):
    """out = attn @ Wo + bo + enhanced_bias, per (bm, H) row-tile."""
    y = jnp.dot(attn_ref[...], wo_ref[...], preferred_element_type=jnp.float32)
    o_ref[...] = (y + bo_ref[...]
                  + bias_ref[...].astype(jnp.float32)).astype(o_ref.dtype)


# --------------------------------------------------------------------------
# BlockSpec helpers
# --------------------------------------------------------------------------
def _row_spec(bm, width):
    return pl.BlockSpec((bm, width), lambda i: (i, 0))


def _resident_spec(arr):
    """Whole-array VMEM-resident input, single-buffered when supported."""
    idx = lambda *_args: (0,) * arr.ndim
    if hasattr(pl, "Buffered"):
        try:
            return pl.BlockSpec(arr.shape, idx, pipeline_mode=pl.Buffered(1))
        except TypeError:  # older BlockSpec without pipeline_mode
            pass
    return pl.BlockSpec(arr.shape, idx)


# --------------------------------------------------------------------------
# Weight preparation (hoist out of the per-call path; cacheable per layer)
# --------------------------------------------------------------------------
def prepare_layer_weights(params, layer_idx, compute_dtype=jnp.bfloat16):
    cd = compute_dtype
    w = {}
    # fused Q/K/V weight: one (H, 3H) matmul instead of three (H, H)
    w["wqkv"] = jnp.concatenate(
        [params["wq"], params["wk"], params["wv"]], axis=1).astype(cd)
    w["bqkv"] = jnp.concatenate(
        [params["bq"], params["bk"], params["bv"]]).reshape(1, -1).astype(jnp.float32)
    # layer-specific adaptive-feature-mapping weights
    w["w1"] = params["afm_w1"][layer_idx].astype(cd)
    w["b1"] = params["afm_b1"][layer_idx].reshape(1, -1).astype(jnp.float32)
    w["w2"] = params["afm_w2"][layer_idx].astype(cd)
    w["b2"] = params["afm_b2"][layer_idx].reshape(1, -1).astype(jnp.float32)
    w["ln_g"] = params["afm_gamma"][layer_idx].reshape(1, -1).astype(jnp.float32)
    w["ln_b"] = params["afm_beta"][layer_idx].reshape(1, -1).astype(jnp.float32)
    # fold mixing softmax + (global, local, projection) into one (H, H) weight
    mix = jax.nn.softmax(params["hpt_mixing"][layer_idx])
    w["w_eff"] = (mix[0] * params["hpt_global"]
                  + mix[1] * (params["hpt_local"][layer_idx] @ params["hpt_proj"])
                  ).astype(cd)
    # output projection + content gate (gate stays f32, computed in XLA; tiny)
    w["wo"] = params["wo"].astype(cd)
    w["bo"] = params["bo"].reshape(1, -1).astype(jnp.float32)
    w["gate_w1"], w["gate_b1"] = params["gate_w1"], params["gate_b1"]
    w["gate_w2"], w["gate_b2"] = params["gate_w2"], params["gate_b2"]
    return w


# --------------------------------------------------------------------------
# Forward wrapper
# --------------------------------------------------------------------------
def enhanced_attention_layer(hidden_states, layer_idx, params=None, *,
                             num_heads, attention_mask=None,
                             compute_dtype=jnp.bfloat16, block_m=512,
                             prepared=None):
    """hidden_states: (B, S, H).  Returns (B, S, H) in hidden_states.dtype."""
    if attention_mask is not None:
        # TODO(synk): additive attention_mask path not implemented.
        raise NotImplementedError("attention_mask is not supported")

    B, S, H = hidden_states.shape
    hd = H // num_heads
    M = B * S

    w = prepared if prepared is not None else prepare_layer_weights(
        params, layer_idx, compute_dtype)
    cd = jnp.dtype(w["wqkv"].dtype)

    # ---------------- tiling / VMEM budget ----------------
    bm = min(block_m, _round_up(M, 8))
    Mp = _round_up(M, bm)
    pad = Mp - M                 # 0 in the common case (no jnp.pad copies)
    grid_m = Mp // bm
    tq = _choose_q_tile(S)
    nq = S // tq

    isz = cd.itemsize
    weight_elems = 3 * H * H + 2 * (H * (H // 2)) + H * H   # wqkv, w1, w2, w_eff
    est1 = (weight_elems * isz                               # resident weights (1x)
            + 2 * bm * (5 * H + 1) * isz                     # streamed tiles (2x buf)
            + 3 * bm * 3 * H * 4)                            # f32 intermediates
    est2 = 2 * (2 * tq + 2 * S) * H * isz + 2 * tq * S * 4   # qkv blocks + scores
    est3 = H * H * isz + 2 * bm * 3 * H * isz
    vmem_limit = int(min(max(2 * max(est1, est2, est3), 32 * (1 << 20)),
                         100 * (1 << 20)))

    def cparams(sem):
        return pltpu.CompilerParams(dimension_semantics=sem,
                                    vmem_limit_bytes=vmem_limit)

    # ---------------- wrapper-side glue (cheap, once per call) ----------------
    x2d = hidden_states.reshape(M, H).astype(cd)

    # content gate: per-batch scalar from the seq-mean — O(B*H*64), left in XLA.
    pooled = hidden_states.mean(axis=1)                               # (B, H)
    g = jax.nn.relu(pooled @ w["gate_w1"] + w["gate_b1"])
    gate = jax.nn.sigmoid(g @ w["gate_w2"] + w["gate_b2"])            # (B, 1)
    gate_rows = jnp.broadcast_to(gate[:, None, :], (B, S, 1)).reshape(M, 1)

    if pad:
        x_in = jnp.pad(x2d, ((0, pad), (0, 0)))
        gate_in = jnp.pad(gate_rows, ((0, pad), (0, 0)))
    else:
        x_in, gate_in = x2d, gate_rows

    # -------- kernel 1: fused QKV projection + enhanced prefix bias ---------
    qkv_p, bias_p = pl.pallas_call(
        _prefix_qkv_kernel,
        grid=(grid_m,),
        in_specs=[
            _row_spec(bm, H), _row_spec(bm, 1),
            _resident_spec(w["wqkv"]), _resident_spec(w["bqkv"]),
            _resident_spec(w["w1"]), _resident_spec(w["b1"]),
            _resident_spec(w["w2"]), _resident_spec(w["b2"]),
            _resident_spec(w["ln_g"]), _resident_spec(w["ln_b"]),
            _resident_spec(w["w_eff"]),
        ],
        out_specs=(_row_spec(bm, 3 * H), _row_spec(bm, H)),
        out_shape=(jax.ShapeDtypeStruct((Mp, 3 * H), cd),
                   jax.ShapeDtypeStruct((Mp, H), cd)),
        compiler_params=cparams(("parallel",)),
    )(x_in, gate_in, w["wqkv"], w["bqkv"], w["w1"], w["b1"], w["w2"], w["b2"],
      w["ln_g"], w["ln_b"], w["w_eff"])

    # -------------------- kernel 2: multi-head attention --------------------
    # (M, 3H) -> (B, S, 3, nh, hd) is a layout-preserving (free) reshape; the
    # BlockSpec index_maps pick batch / {q,k,v} slab / Q-tile — no transposes.
    qkv2d = qkv_p if pad == 0 else qkv_p[:M]
    qkv5 = qkv2d.reshape(B, S, 3, num_heads, hd)

    attn4 = pl.pallas_call(
        functools.partial(_attention_kernel, scale=hd ** -0.5),
        grid=(B, nq),
        in_specs=[
            pl.BlockSpec((None, tq, None, num_heads, hd),
                         lambda b, qi: (b, qi, 0, 0, 0)),
            pl.BlockSpec((None, S, None, num_heads, hd),
                         lambda b, qi: (b, 0, 1, 0, 0)),
            pl.BlockSpec((None, S, None, num_heads, hd),
                         lambda b, qi: (b, 0, 2, 0, 0)),
        ],
        out_specs=pl.BlockSpec((None, tq, num_heads, hd),
                               lambda b, qi: (b, qi, 0, 0)),
        out_shape=jax.ShapeDtypeStruct((B, S, num_heads, hd), cd),
        compiler_params=cparams(("parallel", "parallel")),
    )(qkv5, qkv5, qkv5)

    # (B, S, nh, hd) -> (M, H) is again a free reshape (head-major columns).
    attn2d = attn4.reshape(M, H)
    attn_in = attn2d if pad == 0 else jnp.pad(attn2d, ((0, pad), (0, 0)))

    # ------------- kernel 3: output projection + prefix-bias add ------------
    out_p = pl.pallas_call(
        _out_proj_kernel,
        grid=(grid_m,),
        in_specs=[_row_spec(bm, H), _row_spec(bm, H),
                  _resident_spec(w["wo"]), _resident_spec(w["bo"])],
        out_specs=_row_spec(bm, H),
        out_shape=jax.ShapeDtypeStruct((Mp, H), hidden_states.dtype),
        compiler_params=cparams(("parallel",)),
    )(attn_in, bias_p, w["wo"], w["bo"])

    out = out_p if pad == 0 else out_p[:M]
    return out.reshape(B, S, H)


# --------------------------------------------------------------------------
# Parameter init (mirrors the PyTorch module's init, weights stored (in, out))
# --------------------------------------------------------------------------
def _xavier(key, fan_in, fan_out, gain):
    bound = gain * math.sqrt(6.0 / (fan_in + fan_out))
    return jax.random.uniform(key, (fan_in, fan_out), jnp.float32, -bound, bound)


def _default_linear(key, fan_in, fan_out):
    kw, kb = jax.random.split(key)
    bound = 1.0 / math.sqrt(fan_in)
    w = jax.random.uniform(kw, (fan_in, fan_out), jnp.float32, -bound, bound)
    b = jax.random.uniform(kb, (fan_out,), jnp.float32, -bound, bound)
    return w, b


def init_params(key, hidden_size, num_layers):
    H = hidden_size
    ks = iter(jax.random.split(key, 8 + 3 * num_layers))
    p = {}
    p["wq"], p["bq"] = _default_linear(next(ks), H, H)
    p["wk"], p["bk"] = _default_linear(next(ks), H, H)
    p["wv"], p["bv"] = _default_linear(next(ks), H, H)
    p["wo"], p["bo"] = _default_linear(next(ks), H, H)
    p["afm_w1"] = jnp.stack([_xavier(next(ks), H, H // 2, 0.1)
                             for _ in range(num_layers)])
    p["afm_b1"] = jnp.zeros((num_layers, H // 2), jnp.float32)
    p["afm_w2"] = jnp.stack([_xavier(next(ks), H // 2, H, 0.1)
                             for _ in range(num_layers)])
    p["afm_b2"] = jnp.zeros((num_layers, H), jnp.float32)
    p["afm_gamma"] = jnp.ones((num_layers, H), jnp.float32)
    p["afm_beta"] = jnp.zeros((num_layers, H), jnp.float32)
    p["gate_w1"], p["gate_b1"] = _default_linear(next(ks), H, 64)
    p["gate_w2"], p["gate_b2"] = _default_linear(next(ks), 64, 1)
    p["hpt_global"] = _xavier(next(ks), H, H, 0.1)
    p["hpt_local"] = jnp.stack([_xavier(next(ks), H, H // 4, 0.1)
                                for _ in range(num_layers)])
    p["hpt_proj"] = _xavier(next(ks), H // 4, H, 0.1)
    p["hpt_mixing"] = jnp.full((num_layers, 2), 0.5, jnp.float32)
    return p


# --------------------------------------------------------------------------
# Pure-JAX reference mirroring the PyTorch forward
# --------------------------------------------------------------------------
def _reference(hidden_states, layer_idx, params, num_heads):
    B, S, H = hidden_states.shape
    hd = H // num_heads
    x = hidden_states

    with jax.default_matmul_precision("float32"):
        q = x @ params["wq"] + params["bq"]
        k = x @ params["wk"] + params["bk"]
        v = x @ params["wv"] + params["bv"]

        def heads(t):
            return t.reshape(B, S, num_heads, hd).transpose(0, 2, 1, 3)

        q, k, v = heads(q), heads(k), heads(v)
        s = jnp.einsum("bhqd,bhkd->bhqk", q, k) * hd ** -0.5
        p = jax.nn.softmax(s, axis=-1)
        ctx = jnp.einsum("bhqk,bhkd->bhqd", p, v)
        ctx = ctx.transpose(0, 2, 1, 3).reshape(B, S, H)
        attn_out = ctx @ params["wo"] + params["bo"]

        h = jax.nn.gelu(x @ params["afm_w1"][layer_idx]
                        + params["afm_b1"][layer_idx], approximate=True)
        m = h @ params["afm_w2"][layer_idx] + params["afm_b2"][layer_idx]
        mu = m.mean(-1, keepdims=True)
        var = jnp.square(m - mu).mean(-1, keepdims=True)
        ln = ((m - mu) * jax.lax.rsqrt(var + 1e-5)
              * params["afm_gamma"][layer_idx] + params["afm_beta"][layer_idx])

        pooled = x.mean(axis=1, keepdims=True)                        # (B,1,H)
        g = jax.nn.relu(pooled @ params["gate_w1"] + params["gate_b1"])
        gate = jax.nn.sigmoid(g @ params["gate_w2"] + params["gate_b2"])
        adaptive = gate * ln + (1.0 - gate) * _elu_plus_one(x)

        mix = jax.nn.softmax(params["hpt_mixing"][layer_idx])
        gb = adaptive @ params["hpt_global"]
        lb = (adaptive @ params["hpt_local"][layer_idx]) @ params["hpt_proj"]
        bias = mix[0] * gb + mix[1] * lb

    return attn_out + bias


if __name__ == "__main__":
    B, S, H = 2, 8, 32
    num_heads, num_layers, layer_idx = 4, 3, 1

    key = jax.random.PRNGKey(0)
    k_x, k_p = jax.random.split(key)
    hidden_states = jax.random.normal(k_x, (B, S, H), jnp.float32)
    params = init_params(k_p, H, num_layers)

    ref = _reference(hidden_states, layer_idx, params, num_heads)

    # primary path: bf16 MXU operands (f32 accumulation), prepared weights hoisted
    prepped = prepare_layer_weights(params, layer_idx, jnp.bfloat16)
    out = enhanced_attention_layer(hidden_states, layer_idx, params,
                                   num_heads=num_heads, prepared=prepped)
    out = jax.block_until_ready(out)
    assert out.shape == (B, S, H)
    assert jnp.allclose(out.astype(jnp.float32), ref, atol=7e-2, rtol=7e-2), (
        f"bf16 mismatch: max|diff|={jnp.max(jnp.abs(out - ref)):.3e}")

    # f32 debug path — tighter tolerance vs the f32 reference
    out32 = enhanced_attention_layer(hidden_states, layer_idx, params,
                                     num_heads=num_heads,
                                     compute_dtype=jnp.float32)
    out32 = jax.block_until_ready(out32)
    assert jnp.allclose(out32, ref, atol=1e-2, rtol=1e-2), (
        f"f32 mismatch: max|diff|={jnp.max(jnp.abs(out32 - ref)):.3e}")

    print("KERNEL_OK")
</pallas_src>

<mosaic_0001>
module attributes {stable_mosaic.version = 11 : i64} {
  func.func @_prefix_qkv_kernel(%arg0: i32, %arg1: memref<16x32xbf16, #tpu.memory_space<vmem>>, %arg2: memref<16x1xf32, #tpu.memory_space<vmem>>, %arg3: memref<32x96xbf16, #tpu.memory_space<vmem>>, %arg4: memref<1x96xf32, #tpu.memory_space<vmem>>, %arg5: memref<32x16xbf16, #tpu.memory_space<vmem>>, %arg6: memref<1x16xf32, #tpu.memory_space<vmem>>, %arg7: memref<16x32xbf16, #tpu.memory_space<vmem>>, %arg8: memref<1x32xf32, #tpu.memory_space<vmem>>, %arg9: memref<1x32xf32, #tpu.memory_space<vmem>>, %arg10: memref<1x32xf32, #tpu.memory_space<vmem>>, %arg11: memref<32x32xbf16, #tpu.memory_space<vmem>>, %arg12: memref<16x96xbf16, #tpu.memory_space<vmem>>, %arg13: memref<16x32xbf16, #tpu.memory_space<vmem>>) attributes {dimension_semantics = [#tpu.dimension_semantics<parallel>], iteration_bounds = array<i64: 1>, scalar_prefetch = 0 : i64, scratch_operands = 0 : i64, tpu.core_type = #tpu.core_type<tc>, window_params = [{transform_indices = @transform_0, window_bounds = array<i64: 16, 32>}, {transform_indices = @transform_1, window_bounds = array<i64: 16, 1>}, {pipeline_mode = #tpu.pipeline_mode<synchronous>, transform_indices = @transform_2, window_bounds = array<i64: 32, 96>}, {pipeline_mode = #tpu.pipeline_mode<synchronous>, transform_indices = @transform_3, window_bounds = array<i64: 1, 96>}, {pipeline_mode = #tpu.pipeline_mode<synchronous>, transform_indices = @transform_4, window_bounds = array<i64: 32, 16>}, {pipeline_mode = #tpu.pipeline_mode<synchronous>, transform_indices = @transform_5, window_bounds = array<i64: 1, 16>}, {pipeline_mode = #tpu.pipeline_mode<synchronous>, transform_indices = @transform_6, window_bounds = array<i64: 16, 32>}, {pipeline_mode = #tpu.pipeline_mode<synchronous>, transform_indices = @transform_7, window_bounds = array<i64: 1, 32>}, {pipeline_mode = #tpu.pipeline_mode<synchronous>, transform_indices = @transform_8, window_bounds = array<i64: 1, 32>}, {pipeline_mode = #tpu.pipeline_mode<synchronous>, transform_indices = @transform_9, window_bounds = array<i64: 1, 32>}, {pipeline_mode = #tpu.pipeline_mode<synchronous>, transform_indices = @transform_10, window_bounds = array<i64: 32, 32>}, {transform_indices = @transform_11, window_bounds = array<i64: 16, 96>}, {transform_indices = @transform_12, window_bounds = array<i64: 16, 32>}]} {
    %c0 = arith.constant 0 : index
    %c0_0 = arith.constant 0 : index
    %0 = vector.load %arg1[%c0, %c0_0] : memref<16x32xbf16, #tpu.memory_space<vmem>>, vector<16x32xbf16>
    %1 = arith.extf %0 : vector<16x32xbf16> to vector<16x32xf32>
    %c0_1 = arith.constant 0 : index
    %c0_2 = arith.constant 0 : index
    %2 = vector.load %arg3[%c0_1, %c0_2] : memref<32x96xbf16, #tpu.memory_space<vmem>>, vector<32x96xbf16>
    %cst = arith.constant dense<0.000000e+00> : vector<16x96xf32>
    %3 = tpu.matmul %0, %2, %cst {dimension_numbers = #tpu.dot_dimension_numbers<[1], [0], [0], [1], [0, 0, 1, 1], [], []>} : vector<16x32xbf16>, vector<32x96xbf16>, vector<16x96xf32> -> vector<16x96xf32>
    %c0_3 = arith.constant 0 : index
    %c0_4 = arith.constant 0 : index
    %4 = vector.load %arg4[%c0_3, %c0_4] : memref<1x96xf32, #tpu.memory_space<vmem>>, vector<1x96xf32>
    %5 = vector.broadcast %4 : vector<1x96xf32> to vector<16x96xf32>
    %6 = arith.addf %3, %5 : vector<16x96xf32>
    %7 = arith.truncf %6 : vector<16x96xf32> to vector<16x96xbf16>
    %c0_5 = arith.constant 0 : index
    %c0_6 = arith.constant 0 : index
    %8 = vector.load %arg12[%c0_5, %c0_6] : memref<16x96xbf16, #tpu.memory_space<vmem>>, vector<16x96xbf16>
    tpu.vector_store %arg12[%c0_5, %c0_6], %7 {strides = array<i32>} : memref<16x96xbf16, #tpu.memory_space<vmem>>, vector<16x96xbf16>,
    %c0_7 = arith.constant 0 : index
    %c0_8 = arith.constant 0 : index
    %9 = vector.load %arg5[%c0_7, %c0_8] : memref<32x16xbf16, #tpu.memory_space<vmem>>, vector<32x16xbf16>
    %cst_9 = arith.constant dense<0.000000e+00> : vector<16x16xf32>
    %10 = tpu.matmul %0, %9, %cst_9 {dimension_numbers = #tpu.dot_dimension_numbers<[1], [0], [0], [1], [0, 0, 1, 1], [], []>} : vector<16x32xbf16>, vector<32x16xbf16>, vector<16x16xf32> -> vector<16x16xf32>
    %c0_10 = arith.constant 0 : index
    %c0_11 = arith.constant 0 : index
    %11 = vector.load %arg6[%c0_10, %c0_11] : memref<1x16xf32, #tpu.memory_space<vmem>>, vector<1x16xf32>
    %12 = vector.broadcast %11 : vector<1x16xf32> to vector<16x16xf32>
    %13 = arith.addf %10, %12 : vector<16x16xf32>
    %14 = arith.mulf %13, %13 : vector<16x16xf32>
    %15 = arith.mulf %13, %14 : vector<16x16xf32>
    %cst_12 = arith.constant 4.471500e-02 : f32
    %16 = vector.broadcast %cst_12 : f32 to vector<16x16xf32>
    %17 = arith.mulf %16, %15 : vector<16x16xf32>
    %18 = arith.addf %13, %17 : vector<16x16xf32>
    %cst_13 = arith.constant 0.797884583 : f32
    %19 = vector.broadcast %cst_13 : f32 to vector<16x16xf32>
    %20 = arith.mulf %19, %18 : vector<16x16xf32>
    %21 = math.tanh %20 : vector<16x16xf32>
    %cst_14 = arith.constant 1.000000e+00 : f32
    %22 = vector.broadcast %cst_14 : f32 to vector<16x16xf32>
    %23 = arith.addf %22, %21 : vector<16x16xf32>
    %cst_15 = arith.constant 5.000000e-01 : f32
    %24 = vector.broadcast %cst_15 : f32 to vector<16x16xf32>
    %25 = arith.mulf %24, %23 : vector<16x16xf32>
    %26 = arith.mulf %13, %25 : vector<16x16xf32>
    %27 = arith.truncf %26 : vector<16x16xf32> to vector<16x16xbf16>
    %c0_16 = arith.constant 0 : index
    %c0_17 = arith.constant 0 : index
    %28 = vector.load %arg7[%c0_16, %c0_17] : memref<16x32xbf16, #tpu.memory_space<vmem>>, vector<16x32xbf16>
    %cst_18 = arith.constant dense<0.000000e+00> : vector<16x32xf32>
    %29 = tpu.matmul %27, %28, %cst_18 {dimension_numbers = #tpu.dot_dimension_numbers<[1], [0], [0], [1], [0, 0, 1, 1], [], []>} : vector<16x16xbf16>, vector<16x32xbf16>, vector<16x32xf32> -> vector<16x32xf32>
    %c0_19 = arith.constant 0 : index
    %c0_20 = arith.constant 0 : index
    %30 = vector.load %arg8[%c0_19, %c0_20] : memref<1x32xf32, #tpu.memory_space<vmem>>, vector<1x32xf32>
    %31 = vector.broadcast %30 : vector<1x32xf32> to vector<16x32xf32>
    %32 = arith.addf %29, %31 : vector<16x32xf32>
    %cst_21 = arith.constant dense<0.000000e+00> : vector<16xf32>
    %33 = vector.multi_reduction <add>, %32, %cst_21 [1] : vector<16x32xf32> to vector<16xf32>
    %34 = vector.shape_cast %33 : vector<16xf32> to vector<16x1xf32>
    %cst_22 = arith.constant 3.200000e+01 : f32
    %35 = vector.broadcast %cst_22 : f32 to vector<16x1xf32>
    %36 = arith.divf %34, %35 : vector<16x1xf32>
    %37 = vector.broadcast %36 : vector<16x1xf32> to vector<16x32xf32>
    %38 = arith.subf %32, %37 : vector<16x32xf32>
    %39 = arith.mulf %38, %38 : vector<16x32xf32>
    %cst_23 = arith.constant dense<0.000000e+00> : vector<16xf32>
    %40 = vector.multi_reduction <add>, %39, %cst_23 [1] : vector<16x32xf32> to vector<16xf32>
    %41 = vector.shape_cast %40 : vector<16xf32> to vector<16x1xf32>
    %cst_24 = arith.constant 3.200000e+01 : f32
    %42 = vector.broadcast %cst_24 : f32 to vector<16x1xf32>
    %43 = arith.divf %41, %42 : vector<16x1xf32>
    %44 = vector.broadcast %36 : vector<16x1xf32> to vector<16x32xf32>
    %45 = arith.subf %32, %44 : vector<16x32xf32>
    %cst_25 = arith.constant 9.99999974E-6 : f32
    %46 = vector.broadcast %cst_25 : f32 to vector<16x1xf32>
    %47 = arith.addf %43, %46 : vector<16x1xf32>
    %48 = math.rsqrt %47 : vector<16x1xf32>
    %49 = vector.broadcast %48 : vector<16x1xf32> to vector<16x32xf32>
    %50 = arith.mulf %45, %49 : vector<16x32xf32>
    %c0_26 = arith.constant 0 : index
    %c0_27 = arith.constant 0 : index
    %51 = vector.load %arg9[%c0_26, %c0_27] : memref<1x32xf32, #tpu.memory_space<vmem>>, vector<1x32xf32>
    %52 = vector.broadcast %51 : vector<1x32xf32> to vector<16x32xf32>
    %53 = arith.mulf %50, %52 : vector<16x32xf32>
    %c0_28 = arith.constant 0 : index
    %c0_29 = arith.constant 0 : index
    %54 = vector.load %arg10[%c0_28, %c0_29] : memref<1x32xf32, #tpu.memory_space<vmem>>, vector<1x32xf32>
    %55 = vector.broadcast %54 : vector<1x32xf32> to vector<16x32xf32>
    %56 = arith.addf %53, %55 : vector<16x32xf32>
    %c0_30 = arith.constant 0 : index
    %c0_31 = arith.constant 0 : index
    %57 = vector.load %arg2[%c0_30, %c0_31] : memref<16x1xf32, #tpu.memory_space<vmem>>, vector<16x1xf32>
    %58 = vector.broadcast %57 : vector<16x1xf32> to vector<16x32xf32>
    %59 = arith.mulf %58, %56 : vector<16x32xf32>
    %cst_32 = arith.constant 1.000000e+00 : f32
    %60 = vector.broadcast %cst_32 : f32 to vector<16x1xf32>
    %61 = arith.subf %60, %57 : vector<16x1xf32>
    %cst_33 = arith.constant 0.000000e+00 : f32
    %62 = vector.broadcast %cst_33 : f32 to vector<16x32xf32>
    %63 = arith.cmpf ogt, %1, %62 : vector<16x32xf32>
    %cst_34 = arith.constant 1.000000e+00 : f32
    %64 = vector.broadcast %cst_34 : f32 to vector<16x32xf32>
    %65 = arith.addf %1, %64 : vector<16x32xf32>
    %cst_35 = arith.constant 0.000000e+00 : f32
    %66 = vector.broadcast %cst_35 : f32 to vector<16x32xf32>
    %67 = arith.minimumf %1, %66 : vector<16x32xf32>
    %68 = math.exp %67 : vector<16x32xf32>
    %69 = arith.select %63, %65, %68 : vector<16x32xi1>, vector<16x32xf32>
    %70 = vector.broadcast %61 : vector<16x1xf32> to vector<16x32xf32>
    %71 = arith.mulf %70, %69 : vector<16x32xf32>
    %72 = arith.addf %59, %71 : vector<16x32xf32>
    %73 = arith.truncf %72 : vector<16x32xf32> to vector<16x32xbf16>
    %c0_36 = arith.constant 0 : index
    %c0_37 = arith.constant 0 : index
    %74 = vector.load %arg11[%c0_36, %c0_37] : memref<32x32xbf16, #tpu.memory_space<vmem>>, vector<32x32xbf16>
    %cst_38 = arith.constant dense<0.000000e+00> : vector<16x32xf32>
    %75 = tpu.matmul %73, %74, %cst_38 {dimension_numbers = #tpu.dot_dimension_numbers<[1], [0], [0], [1], [0, 0, 1, 1], [], []>} : vector<16x32xbf16>, vector<32x32xbf16>, vector<16x32xf32> -> vector<16x32xf32>
    %76 = arith.truncf %75 : vector<16x32xf32> to vector<16x32xbf16>
    %c0_39 = arith.constant 0 : index
    %c0_40 = arith.constant 0 : index
    %77 = vector.load %arg13[%c0_39, %c0_40] : memref<16x32xbf16, #tpu.memory_space<vmem>>, vector<16x32xbf16>
    tpu.vector_store %arg13[%c0_39, %c0_40], %76 {strides = array<i32>} : memref<16x32xbf16, #tpu.memory_space<vmem>>, vector<16x32xbf16>,
    return
  }
  func.func @transform_0(%arg0: i32) -> (i32, i32) {
    %c0_i32 = arith.constant 0 : i32
    %c0_i32_0 = arith.constant 0 : i32
    return %arg0, %c0_i32 : i32, i32
  }
  func.func @transform_1(%arg0: i32) -> (i32, i32) {
    %c0_i32 = arith.constant 0 : i32
    %c0_i32_0 = arith.constant 0 : i32
    return %arg0, %c0_i32 : i32, i32
  }
  func.func @transform_2(%arg0: i32) -> (i32, i32) {
    %c0_i32 = arith.constant 0 : i32
    %c0_i32_0 = arith.constant 0 : i32
    %c0_i32_1 = arith.constant 0 : i32
    return %c0_i32, %c0_i32_0 : i32, i32
  }
  func.func @transform_3(%arg0: i32) -> (i32, i32) {
    %c0_i32 = arith.constant 0 : i32
    %c0_i32_0 = arith.constant 0 : i32
    %c0_i32_1 = arith.constant 0 : i32
    return %c0_i32, %c0_i32_0 : i32, i32
  }
  func.func @transform_4(%arg0: i32) -> (i32, i32) {
    %c0_i32 = arith.constant 0 : i32
    %c0_i32_0 = arith.constant 0 : i32
    %c0_i32_1 = arith.constant 0 : i32
    return %c0_i32, %c0_i32_0 : i32, i32
  }
  func.func @transform_5(%arg0: i32) -> (i32, i32) {
    %c0_i32 = arith.constant 0 : i32
    %c0_i32_0 = arith.constant 0 : i32
    %c0_i32_1 = arith.constant 0 : i32
    return %c0_i32, %c0_i32_0 : i32, i32
  }
  func.func @transform_6(%arg0: i32) -> (i32, i32) {
    %c0_i32 = arith.constant 0 : i32
    %c0_i32_0 = arith.constant 0 : i32
    %c0_i32_1 = arith.constant 0 : i32
    return %c0_i32, %c0_i32_0 : i32, i32
  }
  func.func @transform_7(%arg0: i32) -> (i32, i32) {
    %c0_i32 = arith.constant 0 : i32
    %c0_i32_0 = arith.constant 0 : i32
    %c0_i32_1 = arith.constant 0 : i32
    return %c0_i32, %c0_i32_0 : i32, i32
  }
  func.func @transform_8(%arg0: i32) -> (i32, i32) {
    %c0_i32 = arith.constant 0 : i32
    %c0_i32_0 = arith.constant 0 : i32
    %c0_i32_1 = arith.constant 0 : i32
    return %c0_i32, %c0_i32_0 : i32, i32
  }
  func.func @transform_9(%arg0: i32) -> (i32, i32) {
    %c0_i32 = arith.constant 0 : i32
    %c0_i32_0 = arith.constant 0 : i32
    %c0_i32_1 = arith.constant 0 : i32
    return %c0_i32, %c0_i32_0 : i32, i32
  }
  func.func @transform_10(%arg0: i32) -> (i32, i32) {
    %c0_i32 = arith.constant 0 : i32
    %c0_i32_0 = arith.constant 0 : i32
    %c0_i32_1 = arith.constant 0 : i32
    return %c0_i32, %c0_i32_0 : i32, i32
  }
  func.func @transform_11(%arg0: i32) -> (i32, i32) {
    %c0_i32 = arith.constant 0 : i32
    %c0_i32_0 = arith.constant 0 : i32
    return %arg0, %c0_i32 : i32, i32
  }
  func.func @transform_12(%arg0: i32) -> (i32, i32) {
    %c0_i32 = arith.constant 0 : i32
    %c0_i32_0 = arith.constant 0 : i32
    return %arg0, %c0_i32 : i32, i32
  }
}

</mosaic_0001>

<bundles_post_ra>
// kernel: tpu_custom_call.1
= control target key start
LH: loop header
LB: loop body
LE: loop exit
PB: predicated region body
PF: predicated region fallthrough
CT: control target
= control target key end

     0   :  { %18 = vsyncpa [#allocation3], 0  ;;  %s793_s0 = inlined_call_operand.vmem [shape: bf16[16,32], index: 0, kind: input, shape index: {}]   ;;  %s794_s1 = inlined_call_operand.vmem [shape: f32[16,1], index: 1, kind: input, shape index: {}]   ;;  %s795_s2 = inlined_call_operand.vmem [shape: bf16[32,96], index: 2, kind: input, shape index: {}]   ;;  %s796_s3 = inlined_call_operand.hbm [shape: f32[1,96], index: 3, kind: input, shape index: {}]   ;;  %s797_s4 = inlined_call_operand.vmem [shape: bf16[32,16], index: 4, kind: input, shape index: {}]   ;;  %s798_s5 = inlined_call_operand.vmem [shape: f32[1,16], index: 5, kind: input, shape index: {}]   ;;  %s799_s6 = inlined_call_operand.vmem [shape: bf16[16,32], index: 6, kind: input, shape index: {}]   ;;  %s800_s7 = inlined_call_operand.vmem [shape: f32[1,32], index: 7, kind: input, shape index: {}]   ;;  %s801_s8 = inlined_call_operand.vmem [shape: f32[1,32], index: 8, kind: input, shape index: {}]   ;;  %s802_s9 = inlined_call_operand.vmem [shape: f32[1,32], index: 9, kind: input, shape index: {}]   ;;  %s803_s10 = inlined_call_operand.vmem [shape: bf16[32,32], index: 10, kind: input, shape index: {}]   ;;  %s804_s11 = inlined_call_operand.hbm [shape: bf16[16,96], index: 11, kind: output, shape index: {0}]   ;;  %s805_s12 = inlined_call_operand.hbm [shape: bf16[16,32], index: 12, kind: output, shape index: {1}]  }
   0x1   :  { %19 = vsyncpa [#allocation4], 0 }
   0x2   :  { %20 = vsyncpa [#allocation7], 0  ;;  %s641_s21 = smov [#allocation2]  }
   0x3   :  { %s33_s22 = sshll.u32 %s641_s21, 4  ;;  %s34_s22 = int_to_ptr.vmem [resolvable:$true] %s33_s22 }
   0x4   :  { %s583_s23 = scalar_lea.vmem %s34_s22, 16  ;;  %s587_s24 = scalar_lea.vmem %s34_s22, 32 }
   0x5   :  { %p584_p0 = scmp.ne.s32.totalorder %s34_s22, %s583_s23  ;;  %p588_p1 = scmp.lt.s32.totalorder %s34_s22, %s34_s22 }
   0x6   :  { %p589_p2 = scmp.lt.s32.totalorder %s587_s24, %s583_s23 }
   0x8   :  { %p590_p3 = por %p589_p2, %p588_p1 }
   0xa   :  { %p591_p4 = pnand %p590_p3, %p584_p0 }
   0xc   :  { %594 = shalt.err (!%p591_p4)
}
   0xd   :  { %36 = dma.hbm_to_vmem [thread:$0]  %s796_s3, 16, %s34_s22, [#allocation3]  }
   0xe   :  { %635 = dma.done.wait [#allocation3], 16  }
   0xf   :  { %636 = vsyncadd [#allocation3], 4294967280  ;;  %v642_v0 = vmov 0.0   ;;  %vm643_vm0 = vmmov 0   ;;  %v554_v1 = vld [vmem:[%s797_s4 + $0x8] sm:$0xff]   ;;  %v555_v2 = vld [vmem:[%s797_s4] sm:$0xff]  }
  0x10   :  { %522 = vmatprep.subr.bf16.mxu1 %v642_v0  ;;  %526 = vmatprep.mubr.msk.bf16.mxu1 %vm643_vm0, %v642_v0  ;;  %v732_v3 = vld [vmem:[%s793_s0] sm:$0xff]   ;;  %vm87_vm1 = vcmask 261120   ;;  %v557_v4 = vld [vmem:[%s795_s2 + $0x8] sm:$0xff]   ;;  %vm241_vm2 = vcmask 130048   ;;  %vm140_vm3 = vcmask 781312   ;;  %v644_v44 = vmov 0  }
  0x11   :  { %514 = vmatprep.subr.bf16.mxu0 %v642_v0  ;;  %518 = vmatprep.mubr.msk.bf16.mxu0 %vm643_vm0, %v642_v0  ;;  %v558_v5 = vld [vmem:[%s795_s2] sm:$0xff]   ;;  %v332_v42 = vld [vmem:[%s794_s1 + $0x8] sm:$0xff] }
  0x12   :  { %523 = vmatpush3.bf16.msra.mxu1 %v554_v1  ;;  %515 = vmatpush3.bf16.msra.mxu0 %v557_v4  ;;  %v559_v6 = vld [vmem:[%s799_s6] sm:$0xff]   ;;  %v560_v4 = vld [vmem:[%s803_s10 + $0x8] sm:$0xff]  }
  0x13   :  { %524 = vmatprep.subr.bf16.mxu1 %v642_v0  ;;  %516 = vmatprep.subr.bf16.mxu0 %v642_v0  ;;  %v485_v7 = vld [vmem:[%s798_s5] ss:$0 sm:$0xff] }
  0x14   :  { %v478_v33 = vld [vmem:[#allocation2] ss:$0 sm:$0xff]  ;;  %553 = vset.pattern.permute.xlu1 %v644_v44  ;;  %552 = vset.pattern.permute.xlu0 %v644_v44 }
  0x15   :  { %v331_v43 = vld [vmem:[%s794_s1] sm:$0xff]  ;;  %340 = vperm.xlu1 %553, %v332_v42  }
  0x16   :  { %525 = vmatpush3.bf16.msra.mxu1 %v555_v2  ;;  %517 = vmatpush3.bf16.msra.mxu0 %v558_v5  ;;  %v345_v45 = vsub.f32 1.0, %v331_v43  ;;  %v489_v46 = vld [vmem:[%s800_s7] ss:$0 sm:$0xff]  ;;  %v346_v2 = vsub.f32 1.0, %v332_v42 }
  0x17   :  { %536 = vmatprep.subr.bf16.mxu1 %v642_v0  ;;  %530 = vmatprep.subr.bf16.mxu0 %v642_v0  ;;  %v561_v5 = vld [vmem:[%s803_s10] sm:$0xff]  }
  0x19   :  { %527 = vmatmul.mubr.msk.bf16.vlgmr.msra.gmra.mxu1 %vm87_vm1, %v732_v3  ;;  %519 = vmatmul.mubr.msk.bf16.vlgmr.msra.gmra.mxu0 %vm87_vm1, %v732_v3 }
  0x1a   :  { %540 = vmatprep.mubr.msk.bf16.mxu1 %vm643_vm0, %v642_v0  ;;  %532 = vmatprep.mubr.msk.bf16.mxu0 %vm643_vm0, %v642_v0 }
  0x1b   :  { %531 = vmatpush3.bf16.msra.mxu0 %v559_v6  ;;  %361 = vperm.xlu1 %553, %v345_v45  }
  0x1c   :  { %537 = vmatpush3.bf16.msra.mxu1 %v560_v4 }
  0x1d   :  { %538 = vmatprep.subr.bf16.mxu1 %v642_v0 }
  0x20   :  { %539 = vmatpush3.bf16.msra.mxu1 %v561_v5 }
  0x90   :  { %v341_v6 = vpop.permute.xlu1 %340 }
  0xd9   :  { %v200_v8 = vpop.f32.mrf.mxu1  ;;  %v125_v34 = vpop.f32.mrf.mxu0 }
  0xda   :  { %v201_v9 = vadd.f32 %v485_v7, %v200_v8  ;;  %v126_v35 = vadd.f32 %v478_v33, %v125_v34  ;;  %v57_v8 = vunpack.c.l.bf16 %v732_v3 }
  0xdb   :  { %v528_v10 = vpop.f32.mrf.mxu1  ;;  %v520_v36 = vpop.f32.mrf.mxu0 }
  0xdc   :  { %v207_v11 = vmul.f32 %v201_v9, %v201_v9  ;;  %v499_v37 = vpack.c.bf16 %v126_v35, %v126_v35  ;;  %v351_v10 = vmin.f32 %v57_v8, 0.0  ;;  %vm347_vm4 = vcmp.gt.f32.partialorder %v57_v8, 0.0 }
  0xdd   :  { %v203_v12 = vpop.f32.mrf.mxu1  ;;  %v128_v38 = vpop.f32.mrf.mxu0 }
  0xde   :  { %v209_v13 = vmul.f32 %v207_v11, %v201_v9  ;;  %v204_v14 = vadd.f32 %v485_v7, %v203_v12  ;;  %141 = vst.msk [vmem:[#allocation5] sm:$0xf] %vm140_vm3, %v499_v37  ;;  %v129_v39 = vadd.f32 %v478_v33, %v128_v38  ;;  %v362_v7 = vpop.permute.xlu1 %361 }
  0xdf   :  { %v529_v15 = vpop.f32.mrf.mxu1  ;;  %v521_v40 = vpop.f32.mrf.mxu0 }
  0xe0   :  { %v211_v16 = vmul.f32 0.044715, %v209_v13  ;;  %v208_v17 = vmul.f32 %v204_v14, %v204_v14  ;;  %v500_v41 = vpack.c.bf16 %v129_v39, %v129_v39  ;;  %v353_v15 = vmul.f32 1.442695, %v351_v10 }
  0xe2   :  { %v213_v18 = vadd.f32 %v211_v16, %v201_v9  ;;  %v210_v19 = vmul.f32 %v208_v17, %v204_v14  ;;  %142 = vst.msk [vmem:[#allocation5 + $0x4] sm:$0xf] %vm140_vm3, %v500_v41 }
  0xe4   :  { %v215_v20 = vmul.f32 0.7978846, %v213_v18  ;;  %v212_v21 = vmul.f32 0.044715, %v210_v19 }
  0xe6   :  { %563 = vtanh.f32 %v215_v20  ;;  %v214_v22 = vadd.f32 %v212_v21, %v204_v14  ;;  %v492_v20 = vld [vmem:[%s801_s8] ss:$0 sm:$0xff]  ;;  %s645_s8 = smov [#allocation5]  }
  0xe7   :  { %v493_v21 = vld [vmem:[%s802_s9] ss:$0 sm:$0xff]  ;;  %s450_s9 = sshll.u32 %s645_s8, 4  ;;  %s451_s9 = int_to_ptr.vmem [resolvable:$true] %s450_s9 }
  0xe8   :  { %v216_v23 = vmul.f32 0.7978846, %v214_v22  ;;  %s595_s28 = scalar_lea.vmem %s451_s9, 128  ;;  %p600_p6 = scmp.lt.s32.totalorder %s451_s9, %s451_s9 }
  0xe9   :  { %p596_p5 = scmp.ne.s32.totalorder %s451_s9, %s595_s28  ;;  %p601_p7 = scmp.lt.s32.totalorder %s595_s28, %s595_s28 }
  0xea   :  { %565 = vtanh.f32 %v216_v23 }
  0xeb   :  { %p602_p8 = por %p601_p7, %p600_p6 }
  0xed   :  { %p603_p9 = pnand %p602_p8, %p596_p5 }
  0xf3   :  { %v564_v24 = vpop.eup %563 }
  0xf4   :  { %v219_v25 = vadd.f32 1.0, %v564_v24 }
  0xf6   :  { %v221_v27 = vmul.f32 0.5, %v219_v25  ;;  %v349_v25 = vadd.f32 1.0, %v57_v8 }
  0xf7   :  { %v566_v26 = vpop.eup %565 }
  0xf8   :  { %v220_v28 = vadd.f32 1.0, %v566_v26  ;;  %v223_v30 = vmul.f32 %v221_v27, %v201_v9  ;;  %v58_v9 = vunpack.c.h.bf16 %v732_v3 }
  0xfa   :  { %v222_v29 = vmul.f32 0.5, %v220_v28  ;;  %v352_v13 = vmin.f32 %v58_v9, 0.0  ;;  %v350_v26 = vadd.f32 1.0, %v58_v9  ;;  %vm348_vm5 = vcmp.gt.f32.partialorder %v58_v9, 0.0 }
  0xfc   :  { %v224_v31 = vmul.f32 %v222_v29, %v204_v14  ;;  %v355_v17 = vmul.f32 1.442695, %v352_v13 }
  0xfe   :  { %v225_v32 = vpack.c.bf16 %v224_v31, %v223_v30 }
 0x100   :  { %533 = vmatmul.mubr.msk.bf16.vlgmr.msra.gmra.mxu0 %vm241_vm2, %v225_v32 }
 0x1c0   :  { %v279_v47 = vpop.f32.mrf.mxu0 }
 0x1c1   :  { %v280_v48 = vadd.f32 %v489_v46, %v279_v47 }
 0x1c2   :  { %v534_v49 = vpop.f32.mrf.mxu0 }
 0x1c3   :  { %v286_v50 = vsel %vm87_vm1, %v280_v48, 0.0 }
 0x1c4   :  { %287 = vadd.xlane.f32.xlu0 %v286_v50  ;;  %v282_v51 = vpop.f32.mrf.mxu0 }
 0x1c5   :  { %v283_v52 = vadd.f32 %v489_v46, %v282_v51 }
 0x1c6   :  { %v535_v53 = vpop.f32.mrf.mxu0 }
 0x1c7   :  { %v289_v54 = vsel %vm87_vm1, %v283_v52, 0.0 }
 0x1c8   :  { %290 = vadd.xlane.f32.xlu0 %v289_v54 }
 0x1de   :  { %335 = vperm.xlu0 %552, %v331_v43  }
 0x24d   :  { %v288_v55 = vpop.xlane.xlu0 %287 }
 0x24e   :  { %v293_v56 = vmul.f32 0.03125, %v288_v55 }
 0x250   :  { %v295_v57 = vsub.f32 %v280_v48, %v293_v56 }
 0x251   :  { %v291_v58 = vpop.xlane.xlu0 %290 }
 0x252   :  { %v294_v59 = vmul.f32 0.03125, %v291_v58  ;;  %v297_v60 = vmul.f32 %v295_v57, %v295_v57 }
 0x254   :  { %v296_v61 = vsub.f32 %v283_v52, %v294_v59  ;;  %v299_v62 = vsel %vm87_vm1, %v297_v60, 0.0 }
 0x255   :  { %300 = vadd.xlane.f32.xlu1 %v299_v62 }
 0x256   :  { %v298_v63 = vmul.f32 %v296_v61, %v296_v61 }
 0x258   :  { %v302_v1 = vsel %vm87_vm1, %v298_v63, 0.0 }
 0x259   :  { %303 = vadd.xlane.f32.xlu1 %v302_v1  ;;  %v336_v30 = vpop.permute.xlu0 %335 }
 0x26a   :  { %366 = vperm.xlu1 %553, %v346_v2  }
 0x2de   :  { %v301_v11 = vpop.xlane.xlu1 %300 }
 0x2df   :  { %v305_v12 = vmul.f32 0.03125, %v301_v11 }
 0x2e1   :  { %v307_v14 = vadd.f32 1e-05, %v305_v12 }
 0x2e2   :  { %v304_v16 = vpop.xlane.xlu1 %303 }
 0x2e3   :  { %567 = vrsqrt.f32 %v307_v14  ;;  %v306_v0 = vmul.f32 0.03125, %v304_v16 }
 0x2e4   :  { %569 = vpow2.f32 %v353_v15 }
 0x2e5   :  { %v308_v18 = vadd.f32 1e-05, %v306_v0 }
 0x2e6   :  { %v367_v34 = vpop.permute.xlu1 %366 }
 0x2e7   :  { %571 = vrsqrt.f32 %v308_v18 }
 0x2e8   :  { %573 = vpow2.f32 %v355_v17 }
 0x2f0   :  { %v568_v19 = vpop.eup %567 }
 0x2f1   :  { %v311_v3 = vmul.f32 %v568_v19, %v295_v57  ;;  %v570_v22 = vpop.eup %569 }
 0x2f2   :  { %v357_v32 = vsel %vm347_vm4, %v349_v25, %v570_v22 }
 0x2f3   :  { %v320_v23 = vmul.f32 %v492_v20, %v311_v3  ;;  %v369_v37 = vmul.f32 %v362_v7, %v357_v32 }
 0x2f4   :  { %v572_v24 = vpop.eup %571 }
 0x2f5   :  { %v574_v27 = vpop.eup %573  ;;  %v312_v28 = vmul.f32 %v572_v24, %v296_v61  ;;  %v329_v29 = vadd.f32 %v493_v21, %v320_v23 }
 0x2f6   :  { %v358_v33 = vsel %vm348_vm5, %v350_v26, %v574_v27 }
 0x2f7   :  { %v321_v31 = vmul.f32 %v492_v20, %v312_v28  ;;  %v343_v36 = vmul.f32 %v336_v30, %v329_v29  ;;  %v370_v39 = vmul.f32 %v367_v34, %v358_v33 }
 0x2f9   :  { %v330_v35 = vadd.f32 %v493_v21, %v321_v31  ;;  %v371_v41 = vadd.f32 %v369_v37, %v343_v36 }
 0x2fb   :  { %v344_v38 = vmul.f32 %v341_v6, %v330_v35 }
 0x2fd   :  { %v372_v40 = vadd.f32 %v370_v39, %v344_v38 }
 0x2ff   :  { %v373_v42 = vpack.c.bf16 %v372_v40, %v371_v41 }
 0x301   :  { %541 = vmatmul.mubr.msk.bf16.vlgmr.msra.gmra.mxu1 %vm87_vm1, %v373_v42 }
 0x302   :  { %606 = shalt.err (!%p603_p9)
}
 0x303   :  { %s646_s3 = smov 64   ;;  %s647_s29 = smov 4   ;;  %vm442_vm6 = vcmask 257024  }
 0x304   :  { %456 = dma.vmem_to_hbm [thread:$0]  %s451_s9, 128, %s804_s11, [#allocation4], %s646_s3, %s646_s3, %s647_s29  }
 0x305   :  { %s648_s14 = smov [#allocation6]  }
 0x306   :  { %s462_s15 = sshll.u32 %s648_s14, 4  ;;  %s463_s15 = int_to_ptr.vmem [resolvable:$true] %s462_s15 }
 0x307   :  { %s615_s0 = scalar_lea.vmem %s463_s15, 128  ;;  %p620_p11 = scmp.lt.s32.totalorder %s463_s15, %s463_s15 }
 0x308   :  { %p616_p10 = scmp.ne.s32.totalorder %s463_s15, %s615_s0  ;;  %p621_p12 = scmp.lt.s32.totalorder %s615_s0, %s615_s0 }
 0x30a   :  { %p622_p13 = por %p621_p12, %p620_p11 }
 0x30c   :  { %p623_p0 = pnand %p622_p13, %p616_p10 }
 0x3c1   :  { %v427_v43 = vpop.f32.mrf.mxu1 }
 0x3c2   :  { %v501_v44 = vpack.c.bf16 %v427_v43, %v427_v43 }
 0x3c3   :  { %v542_v45 = vpop.f32.mrf.mxu1 }
 0x3c4   :  { %443 = vst.msk [vmem:[#allocation6] sm:$0xf] %vm442_vm6, %v501_v44 }
 0x3c5   :  { %v430_v46 = vpop.f32.mrf.mxu1 }
 0x3c6   :  { %v502_v47 = vpack.c.bf16 %v430_v46, %v430_v46 }
 0x3c7   :  { %v543_v48 = vpop.f32.mrf.mxu1 }
 0x3c8   :  { %444 = vst.msk [vmem:[#allocation6 + $0x4] sm:$0xf] %vm442_vm6, %v502_v47 }
 0x3c9   :  { %626 = shalt.err (!%p623_p0)
}
 0x3ca   :  { %468 = dma.vmem_to_hbm [thread:$0]  %s463_s15, 128, %s805_s12, [#allocation7], %s646_s3, %s646_s3, %s647_s29  }
 0x3cb   :  { %637 = dma.done.wait [#allocation4], 128  }
 0x3cc   :  { %638 = vsyncadd [#allocation4], 4294967168 }
 0x3cd   :  { %639 = dma.done.wait [#allocation7], 128  }
 0x3ce   :  { %640 = vsyncadd [#allocation7], 4294967168 }
 0x3cf   :  { %475 = vsyncpa [#allocation3], 1 }
 0x3d0   :  { %476 = vsyncpa [#allocation4], 1 }
 0x3d1   :  { %477 = vsyncpa [#allocation7], 1 }

</bundles_post_ra>
